<compile_context>
chip_gen: v6e
topology: v6e:2x2x1
jax: 0.10.0
libtpu: 0.0.40
codegen_flags: <defaults>
</compile_context>

<pallas_src>
import functools
import math

import jax
import jax.numpy as jnp
from jax import lax
from jax.experimental import pallas as pl
from jax.experimental.pallas import tpu as pltpu


def _layernorm(x, w, b, eps=1e-5):
    mu = jnp.mean(x, axis=-1, keepdims=True)
    var = jnp.mean((x - mu) ** 2, axis=-1, keepdims=True)
    return (x - mu) * lax.rsqrt(var + eps) * w + b


def _gelu_exact(x):
    # F.gelu default = exact erf-based GELU
    return 0.5 * x * (1.0 + lax.erf(x * (1.0 / math.sqrt(2.0))))


def block_kernel(
    x_ref,
    ln1w_ref, ln1b_ref,
    wqkv_ref, bqkv_ref,
    wp_ref, bp_ref,
    ln2w_ref, ln2b_ref,
    w1_ref, b1_ref, w2_ref, b2_ref,
    o_ref,
    qh_scr, kh_scr, vh_scr, y_scr,
    *, n_head, block_b,
):
    Bb = block_b
    T = x_ref.shape[1]
    C = x_ref.shape[2]
    hd = C // n_head
    scale = 1.0 / math.sqrt(hd)

    # (Bb, T, C) -> (Bb*T, C): all row-parallel ops (LN / projections / MLP)
    # run on the flattened slab so the MXU sees a tall M dimension.
    x = x_ref[...].reshape(Bb * T, C).astype(jnp.float32)

    # ---- ln1 (f32 math) ----
    h = _layernorm(x, ln1w_ref[0], ln1b_ref[0]).astype(jnp.bfloat16)

    # ---- fused QKV projection: one bf16 MXU pass, f32 accumulate ----
    qkv = jnp.dot(h, wqkv_ref[...], preferred_element_type=jnp.float32) + bqkv_ref[0]

    # ---- stage heads into head-major VMEM slabs (static slices / stores only) ----
    for b in range(Bb):
        rs, re = b * T, (b + 1) * T
        for hh in range(n_head):
            g = b * n_head + hh
            qh_scr[g] = qkv[rs:re, hh * hd:(hh + 1) * hd].astype(jnp.bfloat16)
            kh_scr[g] = qkv[rs:re, C + hh * hd:C + (hh + 1) * hd].astype(jnp.bfloat16)
            vh_scr[g] = qkv[rs:re, 2 * C + hh * hd:2 * C + (hh + 1) * hd].astype(jnp.bfloat16)

    qh = qh_scr[...]          # (Bb*n_head, T, hd) bf16
    kh = kh_scr[...]
    vh = vh_scr[...]

    # ---- causal attention, all heads batched on the MXU ----
    row = lax.broadcasted_iota(jnp.int32, (T, T), 0)
    col = lax.broadcasted_iota(jnp.int32, (T, T), 1)
    causal = (col <= row)[None, :, :]

    att = jnp.einsum("gqd,gkd->gqk", qh, kh,
                     preferred_element_type=jnp.float32) * scale
    att = jnp.where(causal, att, -1e30)
    att = att - jnp.max(att, axis=-1, keepdims=True)
    p = jnp.exp(att)
    p = p * pl.reciprocal(jnp.sum(p, axis=-1, keepdims=True), approx=True)
    # attn_drop: identity (eval mode)
    ctx = jnp.einsum("gqk,gkd->gqd", p.astype(jnp.bfloat16), vh,
                     preferred_element_type=jnp.float32)   # (Bb*n_head, T, hd)

    # ---- gather heads back into a (Bb*T, C) bf16 slab (feeds the proj matmul) ----
    for b in range(Bb):
        rs, re = b * T, (b + 1) * T
        for hh in range(n_head):
            g = b * n_head + hh
            y_scr[rs:re, hh * hd:(hh + 1) * hd] = ctx[g].astype(jnp.bfloat16)

    # ---- output projection + residual (resid_drop: identity in eval mode) ----
    y = jnp.dot(y_scr[...], wp_ref[...], preferred_element_type=jnp.float32) + bp_ref[0]
    x = x + y

    # ---- ln2 + MLP(GELU) + residual ----
    h2 = _layernorm(x, ln2w_ref[0], ln2b_ref[0]).astype(jnp.bfloat16)
    m = jnp.dot(h2, w1_ref[...], preferred_element_type=jnp.float32) + b1_ref[0]
    m = _gelu_exact(m).astype(jnp.bfloat16)
    m = jnp.dot(m, w2_ref[...], preferred_element_type=jnp.float32) + b2_ref[0]
    x = x + m

    o_ref[...] = x.reshape(Bb, T, C).astype(o_ref.dtype)


def _pick_block_b(B, T, C, H, n_head):
    """Largest batch block whose working set stays modest, keeping >=2 grid
    steps when possible so both v7x TensorCores receive work."""
    best = 1
    for bb in range(1, B + 1):
        if B % bb:
            continue
        steps = B // bb
        if B >= 2 and steps < 2:
            continue
        act_bytes = 4 * bb * T * (8 * C + 4 * H) + 4 * bb * n_head * T * T
        if act_bytes <= (8 << 20):
            best = bb
    return best


def _vmem_estimate(block_b, T, C, H, n_head):
    G = block_b * n_head
    hd = C // n_head
    weights = 2 * (C * 3 * C + C * C + C * H + H * C)          # bf16 weights
    small = 4 * (3 * C + 6 * C + H)                            # biases / LN params
    io_blocks = 4 * 2 * 2 * (block_b * T * C)                  # x + out, double-buffered
    acts = 4 * (block_b * T * (3 * C) + 4 * G * T * T
                + 2 * block_b * T * H + 4 * block_b * T * C)
    scratch = 2 * (3 * G * T * hd + block_b * T * C)
    est = 2 * (weights + small + io_blocks + acts + scratch) + (1 << 20)
    return int(min(max(est, 16 * 1024 * 1024), 64 * 1024 * 1024))


def transformer_block(x, params, n_head, block_b=None):
    (ln1w, ln1b, wq, bq, wk, bk, wv, bv, wp, bp,
     ln2w, ln2b, w1, b1, w2, b2) = params
    B, T, C = x.shape
    H = w1.shape[1]
    assert C % n_head == 0
    hd = C // n_head

    if block_b is None:
        block_b = _pick_block_b(B, T, C, H, n_head)
    assert B % block_b == 0

    # Fuse QKV weights/biases; cast weights to bf16 (f32 accumulation in-kernel).
    wqkv = jnp.concatenate([wq, wk, wv], axis=1).astype(jnp.bfloat16)   # (C, 3C)
    bqkv = jnp.concatenate([bq, bk, bv], axis=1).astype(jnp.float32)    # (1, 3C)
    wp_b = wp.astype(jnp.bfloat16)
    w1_b = w1.astype(jnp.bfloat16)
    w2_b = w2.astype(jnp.bfloat16)

    def full2d(shape):
        return pl.BlockSpec(shape, lambda b: (0, 0))

    in_specs = [
        pl.BlockSpec((block_b, T, C), lambda b: (b, 0, 0)),   # x
        full2d((1, C)), full2d((1, C)),                       # ln1 w, b
        full2d((C, 3 * C)), full2d((1, 3 * C)),               # Wqkv, bqkv
        full2d((C, C)), full2d((1, C)),                       # Wproj, bproj
        full2d((1, C)), full2d((1, C)),                       # ln2 w, b
        full2d((C, H)), full2d((1, H)),                       # W1, b1
        full2d((H, C)), full2d((1, C)),                       # W2, b2
    ]

    kernel = functools.partial(block_kernel, n_head=n_head, block_b=block_b)

    return pl.pallas_call(
        kernel,
        out_shape=jax.ShapeDtypeStruct((B, T, C), x.dtype),
        grid_spec=pltpu.PrefetchScalarGridSpec(
            num_scalar_prefetch=0,
            grid=(B // block_b,),
            in_specs=in_specs,
            out_specs=pl.BlockSpec((block_b, T, C), lambda b: (b, 0, 0)),
            scratch_shapes=[
                pltpu.VMEM((block_b * n_head, T, hd), jnp.bfloat16),  # q heads
                pltpu.VMEM((block_b * n_head, T, hd), jnp.bfloat16),  # k heads
                pltpu.VMEM((block_b * n_head, T, hd), jnp.bfloat16),  # v heads
                pltpu.VMEM((block_b * T, C), jnp.bfloat16),           # attn out slab
            ],
        ),
        compiler_params=pltpu.CompilerParams(
            dimension_semantics=("parallel",),
            vmem_limit_bytes=_vmem_estimate(block_b, T, C, H, n_head),
        ),
    )(x, ln1w, ln1b, wqkv, bqkv, wp_b, bp, ln2w, ln2b, w1_b, b1, w2_b, b2)


# --------- pure-JAX reference for verification (f32) ---------
def reference_block(x, params, n_head):
    (ln1w, ln1b, wq, bq, wk, bk, wv, bv, wp, bp,
     ln2w, ln2b, w1, b1, w2, b2) = params
    B, T, C = x.shape
    hd = C // n_head

    def ln(z, w, b):
        mu = jnp.mean(z, -1, keepdims=True)
        var = jnp.mean((z - mu) ** 2, -1, keepdims=True)
        return (z - mu) / jnp.sqrt(var + 1e-5) * w[0] + b[0]

    h = ln(x, ln1w, ln1b)
    q = (h @ wq + bq[0]).reshape(B, T, n_head, hd).transpose(0, 2, 1, 3)
    k = (h @ wk + bk[0]).reshape(B, T, n_head, hd).transpose(0, 2, 1, 3)
    v = (h @ wv + bv[0]).reshape(B, T, n_head, hd).transpose(0, 2, 1, 3)
    att = jnp.einsum("bhqd,bhkd->bhqk", q, k) / math.sqrt(hd)
    mask = jnp.tril(jnp.ones((T, T), bool))
    att = jnp.where(mask, att, -jnp.inf)
    att = jax.nn.softmax(att, axis=-1)
    y = jnp.einsum("bhqk,bhkd->bhqd", att, v).transpose(0, 2, 1, 3).reshape(B, T, C)
    x = x + (y @ wp + bp[0])
    h2 = ln(x, ln2w, ln2b)
    m = h2 @ w1 + b1[0]
    m = 0.5 * m * (1.0 + lax.erf(m / math.sqrt(2.0)))
    m = m @ w2 + b2[0]
    return x + m


if __name__ == "__main__":
    # small config: n_embd=32, n_head=4, seq len T = block_size*number_of_tokens = 8, batch=2
    B, T, C, n_head = 2, 8, 32, 4
    H = 4 * C

    key = jax.random.PRNGKey(0)
    ks = jax.random.split(key, 16)
    s = 0.02
    params = (
        jnp.ones((1, C), jnp.float32),                           # ln1 weight
        jnp.zeros((1, C), jnp.float32),                          # ln1 bias
        s * jax.random.normal(ks[0], (C, C), jnp.float32),       # Wq
        s * jax.random.normal(ks[1], (1, C), jnp.float32),       # bq
        s * jax.random.normal(ks[2], (C, C), jnp.float32),       # Wk
        s * jax.random.normal(ks[3], (1, C), jnp.float32),       # bk
        s * jax.random.normal(ks[4], (C, C), jnp.float32),       # Wv
        s * jax.random.normal(ks[5], (1, C), jnp.float32),       # bv
        s * jax.random.normal(ks[6], (C, C), jnp.float32),       # Wproj
        s * jax.random.normal(ks[7], (1, C), jnp.float32),       # bproj
        jnp.ones((1, C), jnp.float32),                           # ln2 weight
        jnp.zeros((1, C), jnp.float32),                          # ln2 bias
        s * jax.random.normal(ks[8], (C, H), jnp.float32),       # W1
        s * jax.random.normal(ks[9], (1, H), jnp.float32),       # b1
        s * jax.random.normal(ks[10], (H, C), jnp.float32),      # W2
        s * jax.random.normal(ks[11], (1, C), jnp.float32),      # b2
    )

    x = jax.random.normal(ks[12], (B, T, C), jnp.float32)

    out = transformer_block(x, params, n_head)
    out = jax.block_until_ready(out)

    ref = reference_block(x, params, n_head)
    assert out.shape == (B, T, C)
    # bf16 matmuls -> relaxed tolerance vs. the f32 reference
    assert jnp.allclose(out, ref, atol=2e-2, rtol=2e-2), "mismatch vs reference"

    print("KERNEL_OK")
</pallas_src>

<mosaic_0001>
module attributes {stable_mosaic.version = 11 : i64} {
  func.func @block_kernel(%arg0: i32, %arg1: memref<1x8x32xf32, #tpu.memory_space<vmem>>, %arg2: memref<1x32xf32, #tpu.memory_space<vmem>>, %arg3: memref<1x32xf32, #tpu.memory_space<vmem>>, %arg4: memref<32x96xbf16, #tpu.memory_space<vmem>>, %arg5: memref<1x96xf32, #tpu.memory_space<vmem>>, %arg6: memref<32x32xbf16, #tpu.memory_space<vmem>>, %arg7: memref<1x32xf32, #tpu.memory_space<vmem>>, %arg8: memref<1x32xf32, #tpu.memory_space<vmem>>, %arg9: memref<1x32xf32, #tpu.memory_space<vmem>>, %arg10: memref<32x128xbf16, #tpu.memory_space<vmem>>, %arg11: memref<1x128xf32, #tpu.memory_space<vmem>>, %arg12: memref<128x32xbf16, #tpu.memory_space<vmem>>, %arg13: memref<1x32xf32, #tpu.memory_space<vmem>>, %arg14: memref<1x8x32xf32, #tpu.memory_space<vmem>>, %arg15: memref<4x8x8xbf16, #tpu.memory_space<vmem>>, %arg16: memref<4x8x8xbf16, #tpu.memory_space<vmem>>, %arg17: memref<4x8x8xbf16, #tpu.memory_space<vmem>>, %arg18: memref<8x32xbf16, #tpu.memory_space<vmem>>) attributes {dimension_semantics = [#tpu.dimension_semantics<parallel>], iteration_bounds = array<i64: 2>, scalar_prefetch = 0 : i64, scratch_operands = 4 : i64, tpu.core_type = #tpu.core_type<tc>, window_params = [{transform_indices = @transform_0, window_bounds = array<i64: 1, 8, 32>}, {pipeline_mode = #tpu.pipeline_mode<synchronous>, transform_indices = @transform_1, window_bounds = array<i64: 1, 32>}, {pipeline_mode = #tpu.pipeline_mode<synchronous>, transform_indices = @transform_2, window_bounds = array<i64: 1, 32>}, {pipeline_mode = #tpu.pipeline_mode<synchronous>, transform_indices = @transform_3, window_bounds = array<i64: 32, 96>}, {pipeline_mode = #tpu.pipeline_mode<synchronous>, transform_indices = @transform_4, window_bounds = array<i64: 1, 96>}, {pipeline_mode = #tpu.pipeline_mode<synchronous>, transform_indices = @transform_5, window_bounds = array<i64: 32, 32>}, {pipeline_mode = #tpu.pipeline_mode<synchronous>, transform_indices = @transform_6, window_bounds = array<i64: 1, 32>}, {pipeline_mode = #tpu.pipeline_mode<synchronous>, transform_indices = @transform_7, window_bounds = array<i64: 1, 32>}, {pipeline_mode = #tpu.pipeline_mode<synchronous>, transform_indices = @transform_8, window_bounds = array<i64: 1, 32>}, {pipeline_mode = #tpu.pipeline_mode<synchronous>, transform_indices = @transform_9, window_bounds = array<i64: 32, 128>}, {pipeline_mode = #tpu.pipeline_mode<synchronous>, transform_indices = @transform_10, window_bounds = array<i64: 1, 128>}, {pipeline_mode = #tpu.pipeline_mode<synchronous>, transform_indices = @transform_11, window_bounds = array<i64: 128, 32>}, {pipeline_mode = #tpu.pipeline_mode<synchronous>, transform_indices = @transform_12, window_bounds = array<i64: 1, 32>}, {transform_indices = @transform_13, window_bounds = array<i64: 1, 8, 32>}]} {
    %c0 = arith.constant 0 : index
    %c0_0 = arith.constant 0 : index
    %c0_1 = arith.constant 0 : index
    %0 = vector.load %arg1[%c0, %c0_0, %c0_1] : memref<1x8x32xf32, #tpu.memory_space<vmem>>, vector<1x8x32xf32>
    %1 = vector.shape_cast %0 : vector<1x8x32xf32> to vector<8x32xf32>
    %c0_2 = arith.constant 0 : index
    %c0_3 = arith.constant 0 : index
    %2 = vector.load %arg2[%c0_2, %c0_3] : memref<1x32xf32, #tpu.memory_space<vmem>>, vector<1x32xf32>
    %3 = vector.shape_cast %2 : vector<1x32xf32> to vector<32xf32>
    %c0_4 = arith.constant 0 : index
    %c0_5 = arith.constant 0 : index
    %4 = vector.load %arg3[%c0_4, %c0_5] : memref<1x32xf32, #tpu.memory_space<vmem>>, vector<1x32xf32>
    %5 = vector.shape_cast %4 : vector<1x32xf32> to vector<32xf32>
    %cst = arith.constant dense<0.000000e+00> : vector<8xf32>
    %6 = vector.multi_reduction <add>, %1, %cst [1] : vector<8x32xf32> to vector<8xf32>
    %7 = vector.shape_cast %6 : vector<8xf32> to vector<8x1xf32>
    %cst_6 = arith.constant 3.200000e+01 : f32
    %8 = vector.broadcast %cst_6 : f32 to vector<8x1xf32>
    %9 = arith.divf %7, %8 : vector<8x1xf32>
    %10 = vector.broadcast %9 : vector<8x1xf32> to vector<8x32xf32>
    %11 = arith.subf %1, %10 : vector<8x32xf32>
    %12 = arith.mulf %11, %11 : vector<8x32xf32>
    %cst_7 = arith.constant dense<0.000000e+00> : vector<8xf32>
    %13 = vector.multi_reduction <add>, %12, %cst_7 [1] : vector<8x32xf32> to vector<8xf32>
    %14 = vector.shape_cast %13 : vector<8xf32> to vector<8x1xf32>
    %cst_8 = arith.constant 3.200000e+01 : f32
    %15 = vector.broadcast %cst_8 : f32 to vector<8x1xf32>
    %16 = arith.divf %14, %15 : vector<8x1xf32>
    %17 = vector.broadcast %9 : vector<8x1xf32> to vector<8x32xf32>
    %18 = arith.subf %1, %17 : vector<8x32xf32>
    %cst_9 = arith.constant 9.99999974E-6 : f32
    %19 = vector.broadcast %cst_9 : f32 to vector<8x1xf32>
    %20 = arith.addf %16, %19 : vector<8x1xf32>
    %21 = math.rsqrt %20 : vector<8x1xf32>
    %22 = vector.broadcast %21 : vector<8x1xf32> to vector<8x32xf32>
    %23 = arith.mulf %18, %22 : vector<8x32xf32>
    %24 = vector.shape_cast %3 : vector<32xf32> to vector<1x32xf32>
    %25 = vector.broadcast %24 : vector<1x32xf32> to vector<8x32xf32>
    %26 = arith.mulf %23, %25 : vector<8x32xf32>
    %27 = vector.shape_cast %5 : vector<32xf32> to vector<1x32xf32>
    %28 = vector.broadcast %27 : vector<1x32xf32> to vector<8x32xf32>
    %29 = arith.addf %26, %28 : vector<8x32xf32>
    %30 = arith.truncf %29 : vector<8x32xf32> to vector<8x32xbf16>
    %c0_10 = arith.constant 0 : index
    %c0_11 = arith.constant 0 : index
    %31 = vector.load %arg4[%c0_10, %c0_11] : memref<32x96xbf16, #tpu.memory_space<vmem>>, vector<32x96xbf16>
    %cst_12 = arith.constant dense<0.000000e+00> : vector<8x96xf32>
    %32 = tpu.matmul %30, %31, %cst_12 {dimension_numbers = #tpu.dot_dimension_numbers<[1], [0], [0], [1], [0, 0, 1, 1], [], []>} : vector<8x32xbf16>, vector<32x96xbf16>, vector<8x96xf32> -> vector<8x96xf32>
    %c0_13 = arith.constant 0 : index
    %c0_14 = arith.constant 0 : index
    %33 = vector.load %arg5[%c0_13, %c0_14] : memref<1x96xf32, #tpu.memory_space<vmem>>, vector<1x96xf32>
    %34 = vector.shape_cast %33 : vector<1x96xf32> to vector<96xf32>
    %35 = vector.shape_cast %34 : vector<96xf32> to vector<1x96xf32>
    %36 = vector.broadcast %35 : vector<1x96xf32> to vector<8x96xf32>
    %37 = arith.addf %32, %36 : vector<8x96xf32>
    %38 = vector.extract_strided_slice %37 {offsets = [0, 0], sizes = [8, 8], strides = [1, 1]} : vector<8x96xf32> to vector<8x8xf32>
    %39 = arith.truncf %38 : vector<8x8xf32> to vector<8x8xbf16>
    %c0_15 = arith.constant 0 : index
    %c0_16 = arith.constant 0 : index
    %c0_17 = arith.constant 0 : index
    %40 = vector.load %arg15[%c0_15, %c0_16, %c0_17] : memref<4x8x8xbf16, #tpu.memory_space<vmem>>, vector<1x8x8xbf16>
    %41 = vector.shape_cast %40 : vector<1x8x8xbf16> to vector<8x8xbf16>
    %42 = vector.shape_cast %39 : vector<8x8xbf16> to vector<1x8x8xbf16>
    tpu.vector_store %arg15[%c0_15, %c0_16, %c0_17], %42 {strides = array<i32>} : memref<4x8x8xbf16, #tpu.memory_space<vmem>>, vector<1x8x8xbf16>,
    %43 = vector.extract_strided_slice %37 {offsets = [0, 32], sizes = [8, 8], strides = [1, 1]} : vector<8x96xf32> to vector<8x8xf32>
    %44 = arith.truncf %43 : vector<8x8xf32> to vector<8x8xbf16>
    %c0_18 = arith.constant 0 : index
    %c0_19 = arith.constant 0 : index
    %c0_20 = arith.constant 0 : index
    %45 = vector.load %arg16[%c0_18, %c0_19, %c0_20] : memref<4x8x8xbf16, #tpu.memory_space<vmem>>, vector<1x8x8xbf16>
    %46 = vector.shape_cast %45 : vector<1x8x8xbf16> to vector<8x8xbf16>
    %47 = vector.shape_cast %44 : vector<8x8xbf16> to vector<1x8x8xbf16>
    tpu.vector_store %arg16[%c0_18, %c0_19, %c0_20], %47 {strides = array<i32>} : memref<4x8x8xbf16, #tpu.memory_space<vmem>>, vector<1x8x8xbf16>,
    %48 = vector.extract_strided_slice %37 {offsets = [0, 64], sizes = [8, 8], strides = [1, 1]} : vector<8x96xf32> to vector<8x8xf32>
    %49 = arith.truncf %48 : vector<8x8xf32> to vector<8x8xbf16>
    %c0_21 = arith.constant 0 : index
    %c0_22 = arith.constant 0 : index
    %c0_23 = arith.constant 0 : index
    %50 = vector.load %arg17[%c0_21, %c0_22, %c0_23] : memref<4x8x8xbf16, #tpu.memory_space<vmem>>, vector<1x8x8xbf16>
    %51 = vector.shape_cast %50 : vector<1x8x8xbf16> to vector<8x8xbf16>
    %52 = vector.shape_cast %49 : vector<8x8xbf16> to vector<1x8x8xbf16>
    tpu.vector_store %arg17[%c0_21, %c0_22, %c0_23], %52 {strides = array<i32>} : memref<4x8x8xbf16, #tpu.memory_space<vmem>>, vector<1x8x8xbf16>,
    %53 = vector.extract_strided_slice %37 {offsets = [0, 8], sizes = [8, 8], strides = [1, 1]} : vector<8x96xf32> to vector<8x8xf32>
    %54 = arith.truncf %53 : vector<8x8xf32> to vector<8x8xbf16>
    %c1 = arith.constant 1 : index
    %c0_24 = arith.constant 0 : index
    %c0_25 = arith.constant 0 : index
    %55 = vector.load %arg15[%c1, %c0_24, %c0_25] : memref<4x8x8xbf16, #tpu.memory_space<vmem>>, vector<1x8x8xbf16>
    %56 = vector.shape_cast %55 : vector<1x8x8xbf16> to vector<8x8xbf16>
    %57 = vector.shape_cast %54 : vector<8x8xbf16> to vector<1x8x8xbf16>
    tpu.vector_store %arg15[%c1, %c0_24, %c0_25], %57 {strides = array<i32>} : memref<4x8x8xbf16, #tpu.memory_space<vmem>>, vector<1x8x8xbf16>,
    %58 = vector.extract_strided_slice %37 {offsets = [0, 40], sizes = [8, 8], strides = [1, 1]} : vector<8x96xf32> to vector<8x8xf32>
    %59 = arith.truncf %58 : vector<8x8xf32> to vector<8x8xbf16>
    %c1_26 = arith.constant 1 : index
    %c0_27 = arith.constant 0 : index
    %c0_28 = arith.constant 0 : index
    %60 = vector.load %arg16[%c1_26, %c0_27, %c0_28] : memref<4x8x8xbf16, #tpu.memory_space<vmem>>, vector<1x8x8xbf16>
    %61 = vector.shape_cast %60 : vector<1x8x8xbf16> to vector<8x8xbf16>
    %62 = vector.shape_cast %59 : vector<8x8xbf16> to vector<1x8x8xbf16>
    tpu.vector_store %arg16[%c1_26, %c0_27, %c0_28], %62 {strides = array<i32>} : memref<4x8x8xbf16, #tpu.memory_space<vmem>>, vector<1x8x8xbf16>,
    %63 = vector.extract_strided_slice %37 {offsets = [0, 72], sizes = [8, 8], strides = [1, 1]} : vector<8x96xf32> to vector<8x8xf32>
    %64 = arith.truncf %63 : vector<8x8xf32> to vector<8x8xbf16>
    %c1_29 = arith.constant 1 : index
    %c0_30 = arith.constant 0 : index
    %c0_31 = arith.constant 0 : index
    %65 = vector.load %arg17[%c1_29, %c0_30, %c0_31] : memref<4x8x8xbf16, #tpu.memory_space<vmem>>, vector<1x8x8xbf16>
    %66 = vector.shape_cast %65 : vector<1x8x8xbf16> to vector<8x8xbf16>
    %67 = vector.shape_cast %64 : vector<8x8xbf16> to vector<1x8x8xbf16>
    tpu.vector_store %arg17[%c1_29, %c0_30, %c0_31], %67 {strides = array<i32>} : memref<4x8x8xbf16, #tpu.memory_space<vmem>>, vector<1x8x8xbf16>,
    %68 = vector.extract_strided_slice %37 {offsets = [0, 16], sizes = [8, 8], strides = [1, 1]} : vector<8x96xf32> to vector<8x8xf32>
    %69 = arith.truncf %68 : vector<8x8xf32> to vector<8x8xbf16>
    %c2 = arith.constant 2 : index
    %c0_32 = arith.constant 0 : index
    %c0_33 = arith.constant 0 : index
    %70 = vector.load %arg15[%c2, %c0_32, %c0_33] : memref<4x8x8xbf16, #tpu.memory_space<vmem>>, vector<1x8x8xbf16>
    %71 = vector.shape_cast %70 : vector<1x8x8xbf16> to vector<8x8xbf16>
    %72 = vector.shape_cast %69 : vector<8x8xbf16> to vector<1x8x8xbf16>
    tpu.vector_store %arg15[%c2, %c0_32, %c0_33], %72 {strides = array<i32>} : memref<4x8x8xbf16, #tpu.memory_space<vmem>>, vector<1x8x8xbf16>,
    %73 = vector.extract_strided_slice %37 {offsets = [0, 48], sizes = [8, 8], strides = [1, 1]} : vector<8x96xf32> to vector<8x8xf32>
    %74 = arith.truncf %73 : vector<8x8xf32> to vector<8x8xbf16>
    %c2_34 = arith.constant 2 : index
    %c0_35 = arith.constant 0 : index
    %c0_36 = arith.constant 0 : index
    %75 = vector.load %arg16[%c2_34, %c0_35, %c0_36] : memref<4x8x8xbf16, #tpu.memory_space<vmem>>, vector<1x8x8xbf16>
    %76 = vector.shape_cast %75 : vector<1x8x8xbf16> to vector<8x8xbf16>
    %77 = vector.shape_cast %74 : vector<8x8xbf16> to vector<1x8x8xbf16>
    tpu.vector_store %arg16[%c2_34, %c0_35, %c0_36], %77 {strides = array<i32>} : memref<4x8x8xbf16, #tpu.memory_space<vmem>>, vector<1x8x8xbf16>,
    %78 = vector.extract_strided_slice %37 {offsets = [0, 80], sizes = [8, 8], strides = [1, 1]} : vector<8x96xf32> to vector<8x8xf32>
    %79 = arith.truncf %78 : vector<8x8xf32> to vector<8x8xbf16>
    %c2_37 = arith.constant 2 : index
    %c0_38 = arith.constant 0 : index
    %c0_39 = arith.constant 0 : index
    %80 = vector.load %arg17[%c2_37, %c0_38, %c0_39] : memref<4x8x8xbf16, #tpu.memory_space<vmem>>, vector<1x8x8xbf16>
    %81 = vector.shape_cast %80 : vector<1x8x8xbf16> to vector<8x8xbf16>
    %82 = vector.shape_cast %79 : vector<8x8xbf16> to vector<1x8x8xbf16>
    tpu.vector_store %arg17[%c2_37, %c0_38, %c0_39], %82 {strides = array<i32>} : memref<4x8x8xbf16, #tpu.memory_space<vmem>>, vector<1x8x8xbf16>,
    %83 = vector.extract_strided_slice %37 {offsets = [0, 24], sizes = [8, 8], strides = [1, 1]} : vector<8x96xf32> to vector<8x8xf32>
    %84 = arith.truncf %83 : vector<8x8xf32> to vector<8x8xbf16>
    %c3 = arith.constant 3 : index
    %c0_40 = arith.constant 0 : index
    %c0_41 = arith.constant 0 : index
    %85 = vector.load %arg15[%c3, %c0_40, %c0_41] : memref<4x8x8xbf16, #tpu.memory_space<vmem>>, vector<1x8x8xbf16>
    %86 = vector.shape_cast %85 : vector<1x8x8xbf16> to vector<8x8xbf16>
    %87 = vector.shape_cast %84 : vector<8x8xbf16> to vector<1x8x8xbf16>
    tpu.vector_store %arg15[%c3, %c0_40, %c0_41], %87 {strides = array<i32>} : memref<4x8x8xbf16, #tpu.memory_space<vmem>>, vector<1x8x8xbf16>,
    %88 = vector.extract_strided_slice %37 {offsets = [0, 56], sizes = [8, 8], strides = [1, 1]} : vector<8x96xf32> to vector<8x8xf32>
    %89 = arith.truncf %88 : vector<8x8xf32> to vector<8x8xbf16>
    %c3_42 = arith.constant 3 : index
    %c0_43 = arith.constant 0 : index
    %c0_44 = arith.constant 0 : index
    %90 = vector.load %arg16[%c3_42, %c0_43, %c0_44] : memref<4x8x8xbf16, #tpu.memory_space<vmem>>, vector<1x8x8xbf16>
    %91 = vector.shape_cast %90 : vector<1x8x8xbf16> to vector<8x8xbf16>
    %92 = vector.shape_cast %89 : vector<8x8xbf16> to vector<1x8x8xbf16>
    tpu.vector_store %arg16[%c3_42, %c0_43, %c0_44], %92 {strides = array<i32>} : memref<4x8x8xbf16, #tpu.memory_space<vmem>>, vector<1x8x8xbf16>,
    %93 = vector.extract_strided_slice %37 {offsets = [0, 88], sizes = [8, 8], strides = [1, 1]} : vector<8x96xf32> to vector<8x8xf32>
    %94 = arith.truncf %93 : vector<8x8xf32> to vector<8x8xbf16>
    %c3_45 = arith.constant 3 : index
    %c0_46 = arith.constant 0 : index
    %c0_47 = arith.constant 0 : index
    %95 = vector.load %arg17[%c3_45, %c0_46, %c0_47] : memref<4x8x8xbf16, #tpu.memory_space<vmem>>, vector<1x8x8xbf16>
    %96 = vector.shape_cast %95 : vector<1x8x8xbf16> to vector<8x8xbf16>
    %97 = vector.shape_cast %94 : vector<8x8xbf16> to vector<1x8x8xbf16>
    tpu.vector_store %arg17[%c3_45, %c0_46, %c0_47], %97 {strides = array<i32>} : memref<4x8x8xbf16, #tpu.memory_space<vmem>>, vector<1x8x8xbf16>,
    %c0_48 = arith.constant 0 : index
    %c0_49 = arith.constant 0 : index
    %c0_50 = arith.constant 0 : index
    %98 = vector.load %arg15[%c0_48, %c0_49, %c0_50] : memref<4x8x8xbf16, #tpu.memory_space<vmem>>, vector<4x8x8xbf16>
    %c0_51 = arith.constant 0 : index
    %c0_52 = arith.constant 0 : index
    %c0_53 = arith.constant 0 : index
    %99 = vector.load %arg16[%c0_51, %c0_52, %c0_53] : memref<4x8x8xbf16, #tpu.memory_space<vmem>>, vector<4x8x8xbf16>
    %c0_54 = arith.constant 0 : index
    %c0_55 = arith.constant 0 : index
    %c0_56 = arith.constant 0 : index
    %100 = vector.load %arg17[%c0_54, %c0_55, %c0_56] : memref<4x8x8xbf16, #tpu.memory_space<vmem>>, vector<4x8x8xbf16>
    %101 = tpu.iota {dimensions = array<i32: 0>} : vector<8x8xi32>
    %102 = tpu.iota {dimensions = array<i32: 1>} : vector<8x8xi32>
    %103 = arith.cmpi sle, %102, %101 : vector<8x8xi32>
    %104 = vector.shape_cast %103 : vector<8x8xi1> to vector<1x8x8xi1>
    "tpu.trace_start"() <{level = 10 : i32, message = "gqd,gkd->gqk"}> : () -> ()
    %cst_57 = arith.constant dense<0.000000e+00> : vector<4x8x8xf32>
    %105 = tpu.matmul %98, %99, %cst_57 {dimension_numbers = #tpu.dot_dimension_numbers<[2], [2], [1], [1], [0, 0, 0, 1, 1, 1], [0], [0]>} : vector<4x8x8xbf16>, vector<4x8x8xbf16>, vector<4x8x8xf32> -> vector<4x8x8xf32>
    "tpu.trace_stop"() : () -> ()
    %cst_58 = arith.constant 0.353553385 : f32
    %106 = vector.broadcast %cst_58 : f32 to vector<4x8x8xf32>
    %107 = arith.mulf %105, %106 : vector<4x8x8xf32>
    %cst_59 = arith.constant -1.000000e+30 : f32
    %108 = vector.shape_cast %104 : vector<1x8x8xi1> to vector<1x8x8xi1>
    %109 = vector.broadcast %108 : vector<1x8x8xi1> to vector<4x8x8xi1>
    %110 = vector.broadcast %cst_59 : f32 to vector<4x8x8xf32>
    %111 = arith.select %109, %107, %110 : vector<4x8x8xi1>, vector<4x8x8xf32>
    %cst_60 = arith.constant dense<0xFF800000> : vector<4x8xf32>
    %112 = vector.multi_reduction <maximumf>, %111, %cst_60 [2] : vector<4x8x8xf32> to vector<4x8xf32>
    %113 = vector.shape_cast %112 : vector<4x8xf32> to vector<4x8x1xf32>
    %114 = vector.broadcast %113 : vector<4x8x1xf32> to vector<4x8x8xf32>
    %115 = arith.subf %111, %114 : vector<4x8x8xf32>
    %116 = math.exp %115 : vector<4x8x8xf32>
    %cst_61 = arith.constant dense<0.000000e+00> : vector<4x8xf32>
    %117 = vector.multi_reduction <add>, %116, %cst_61 [2] : vector<4x8x8xf32> to vector<4x8xf32>
    %118 = vector.shape_cast %117 : vector<4x8xf32> to vector<4x8x1xf32>
    %119 = tpu.reciprocal %118 {approx = true} : vector<4x8x1xf32> -> vector<4x8x1xf32>
    %120 = vector.broadcast %119 : vector<4x8x1xf32> to vector<4x8x8xf32>
    %121 = arith.mulf %116, %120 : vector<4x8x8xf32>
    %122 = arith.truncf %121 : vector<4x8x8xf32> to vector<4x8x8xbf16>
    "tpu.trace_start"() <{level = 10 : i32, message = "gqk,gkd->gqd"}> : () -> ()
    %cst_62 = arith.constant dense<0.000000e+00> : vector<4x8x8xf32>
    %123 = tpu.matmul %122, %100, %cst_62 {dimension_numbers = #tpu.dot_dimension_numbers<[2], [1], [1], [2], [0, 0, 0, 1, 1, 2], [0], [0]>} : vector<4x8x8xbf16>, vector<4x8x8xbf16>, vector<4x8x8xf32> -> vector<4x8x8xf32>
    "tpu.trace_stop"() : () -> ()
    %124 = vector.extract_strided_slice %123 {offsets = [0, 0, 0], sizes = [1, 8, 8], strides = [1, 1, 1]} : vector<4x8x8xf32> to vector<1x8x8xf32>
    %125 = vector.shape_cast %124 : vector<1x8x8xf32> to vector<8x8xf32>
    %126 = arith.truncf %125 : vector<8x8xf32> to vector<8x8xbf16>
    %c0_63 = arith.constant 0 : index
    %c0_64 = arith.constant 0 : index
    %127 = vector.load %arg18[%c0_63, %c0_64] : memref<8x32xbf16, #tpu.memory_space<vmem>>, vector<8x8xbf16>
    tpu.vector_store %arg18[%c0_63, %c0_64], %126 {strides = array<i32>} : memref<8x32xbf16, #tpu.memory_space<vmem>>, vector<8x8xbf16>,
    %128 = vector.extract_strided_slice %123 {offsets = [1, 0, 0], sizes = [1, 8, 8], strides = [1, 1, 1]} : vector<4x8x8xf32> to vector<1x8x8xf32>
    %129 = vector.shape_cast %128 : vector<1x8x8xf32> to vector<8x8xf32>
    %130 = arith.truncf %129 : vector<8x8xf32> to vector<8x8xbf16>
    %c0_65 = arith.constant 0 : index
    %c8 = arith.constant 8 : index
    %131 = vector.load %arg18[%c0_65, %c8] : memref<8x32xbf16, #tpu.memory_space<vmem>>, vector<8x8xbf16>
    tpu.vector_store %arg18[%c0_65, %c8], %130 {strides = array<i32>} : memref<8x32xbf16, #tpu.memory_space<vmem>>, vector<8x8xbf16>,
    %132 = vector.extract_strided_slice %123 {offsets = [2, 0, 0], sizes = [1, 8, 8], strides = [1, 1, 1]} : vector<4x8x8xf32> to vector<1x8x8xf32>
    %133 = vector.shape_cast %132 : vector<1x8x8xf32> to vector<8x8xf32>
    %134 = arith.truncf %133 : vector<8x8xf32> to vector<8x8xbf16>
    %c0_66 = arith.constant 0 : index
    %c16 = arith.constant 16 : index
    %135 = vector.load %arg18[%c0_66, %c16] : memref<8x32xbf16, #tpu.memory_space<vmem>>, vector<8x8xbf16>
    tpu.vector_store %arg18[%c0_66, %c16], %134 {strides = array<i32>} : memref<8x32xbf16, #tpu.memory_space<vmem>>, vector<8x8xbf16>,
    %136 = vector.extract_strided_slice %123 {offsets = [3, 0, 0], sizes = [1, 8, 8], strides = [1, 1, 1]} : vector<4x8x8xf32> to vector<1x8x8xf32>
    %137 = vector.shape_cast %136 : vector<1x8x8xf32> to vector<8x8xf32>
    %138 = arith.truncf %137 : vector<8x8xf32> to vector<8x8xbf16>
    %c0_67 = arith.constant 0 : index
    %c24 = arith.constant 24 : index
    %139 = vector.load %arg18[%c0_67, %c24] : memref<8x32xbf16, #tpu.memory_space<vmem>>, vector<8x8xbf16>
    tpu.vector_store %arg18[%c0_67, %c24], %138 {strides = array<i32>} : memref<8x32xbf16, #tpu.memory_space<vmem>>, vector<8x8xbf16>,
    %c0_68 = arith.constant 0 : index
    %c0_69 = arith.constant 0 : index
    %140 = vector.load %arg18[%c0_68, %c0_69] : memref<8x32xbf16, #tpu.memory_space<vmem>>, vector<8x32xbf16>
    %c0_70 = arith.constant 0 : index
    %c0_71 = arith.constant 0 : index
    %141 = vector.load %arg6[%c0_70, %c0_71] : memref<32x32xbf16, #tpu.memory_space<vmem>>, vector<32x32xbf16>
    %cst_72 = arith.constant dense<0.000000e+00> : vector<8x32xf32>
    %142 = tpu.matmul %140, %141, %cst_72 {dimension_numbers = #tpu.dot_dimension_numbers<[1], [0], [0], [1], [0, 0, 1, 1], [], []>} : vector<8x32xbf16>, vector<32x32xbf16>, vector<8x32xf32> -> vector<8x32xf32>
    %c0_73 = arith.constant 0 : index
    %c0_74 = arith.constant 0 : index
    %143 = vector.load %arg7[%c0_73, %c0_74] : memref<1x32xf32, #tpu.memory_space<vmem>>, vector<1x32xf32>
    %144 = vector.shape_cast %143 : vector<1x32xf32> to vector<32xf32>
    %145 = vector.shape_cast %144 : vector<32xf32> to vector<1x32xf32>
    %146 = vector.broadcast %145 : vector<1x32xf32> to vector<8x32xf32>
    %147 = arith.addf %142, %146 : vector<8x32xf32>
    %148 = arith.addf %1, %147 : vector<8x32xf32>
    %c0_75 = arith.constant 0 : index
    %c0_76 = arith.constant 0 : index
    %149 = vector.load %arg8[%c0_75, %c0_76] : memref<1x32xf32, #tpu.memory_space<vmem>>, vector<1x32xf32>
    %150 = vector.shape_cast %149 : vector<1x32xf32> to vector<32xf32>
    %c0_77 = arith.constant 0 : index
    %c0_78 = arith.constant 0 : index
    %151 = vector.load %arg9[%c0_77, %c0_78] : memref<1x32xf32, #tpu.memory_space<vmem>>, vector<1x32xf32>
    %152 = vector.shape_cast %151 : vector<1x32xf32> to vector<32xf32>
    %cst_79 = arith.constant dense<0.000000e+00> : vector<8xf32>
    %153 = vector.multi_reduction <add>, %148, %cst_79 [1] : vector<8x32xf32> to vector<8xf32>
    %154 = vector.shape_cast %153 : vector<8xf32> to vector<8x1xf32>
    %cst_80 = arith.constant 3.200000e+01 : f32
    %155 = vector.broadcast %cst_80 : f32 to vector<8x1xf32>
    %156 = arith.divf %154, %155 : vector<8x1xf32>
    %157 = vector.broadcast %156 : vector<8x1xf32> to vector<8x32xf32>
    %158 = arith.subf %148, %157 : vector<8x32xf32>
    %159 = arith.mulf %158, %158 : vector<8x32xf32>
    %cst_81 = arith.constant dense<0.000000e+00> : vector<8xf32>
    %160 = vector.multi_reduction <add>, %159, %cst_81 [1] : vector<8x32xf32> to vector<8xf32>
    %161 = vector.shape_cast %160 : vector<8xf32> to vector<8x1xf32>
    %cst_82 = arith.constant 3.200000e+01 : f32
    %162 = vector.broadcast %cst_82 : f32 to vector<8x1xf32>
    %163 = arith.divf %161, %162 : vector<8x1xf32>
    %164 = vector.broadcast %156 : vector<8x1xf32> to vector<8x32xf32>
    %165 = arith.subf %148, %164 : vector<8x32xf32>
    %cst_83 = arith.constant 9.99999974E-6 : f32
    %166 = vector.broadcast %cst_83 : f32 to vector<8x1xf32>
    %167 = arith.addf %163, %166 : vector<8x1xf32>
    %168 = math.rsqrt %167 : vector<8x1xf32>
    %169 = vector.broadcast %168 : vector<8x1xf32> to vector<8x32xf32>
    %170 = arith.mulf %165, %169 : vector<8x32xf32>
    %171 = vector.shape_cast %150 : vector<32xf32> to vector<1x32xf32>
    %172 = vector.broadcast %171 : vector<1x32xf32> to vector<8x32xf32>
    %173 = arith.mulf %170, %172 : vector<8x32xf32>
    %174 = vector.shape_cast %152 : vector<32xf32> to vector<1x32xf32>
    %175 = vector.broadcast %174 : vector<1x32xf32> to vector<8x32xf32>
    %176 = arith.addf %173, %175 : vector<8x32xf32>
    %177 = arith.truncf %176 : vector<8x32xf32> to vector<8x32xbf16>
    %c0_84 = arith.constant 0 : index
    %c0_85 = arith.constant 0 : index
    %178 = vector.load %arg10[%c0_84, %c0_85] : memref<32x128xbf16, #tpu.memory_space<vmem>>, vector<32x128xbf16>
    %cst_86 = arith.constant dense<0.000000e+00> : vector<8x128xf32>
    %179 = tpu.matmul %177, %178, %cst_86 {dimension_numbers = #tpu.dot_dimension_numbers<[1], [0], [0], [1], [0, 0, 1, 1], [], []>} : vector<8x32xbf16>, vector<32x128xbf16>, vector<8x128xf32> -> vector<8x128xf32>
    %c0_87 = arith.constant 0 : index
    %c0_88 = arith.constant 0 : index
    %180 = vector.load %arg11[%c0_87, %c0_88] : memref<1x128xf32, #tpu.memory_space<vmem>>, vector<1x128xf32>
    %181 = vector.shape_cast %180 : vector<1x128xf32> to vector<128xf32>
    %182 = vector.shape_cast %181 : vector<128xf32> to vector<1x128xf32>
    %183 = vector.broadcast %182 : vector<1x128xf32> to vector<8x128xf32>
    %184 = arith.addf %179, %183 : vector<8x128xf32>
    %cst_89 = arith.constant 5.000000e-01 : f32
    %185 = vector.broadcast %cst_89 : f32 to vector<8x128xf32>
    %186 = arith.mulf %185, %184 : vector<8x128xf32>
    %cst_90 = arith.constant 0.707106769 : f32
    %187 = vector.broadcast %cst_90 : f32 to vector<8x128xf32>
    %188 = arith.mulf %184, %187 : vector<8x128xf32>
    %189 = math.erf %188 : vector<8x128xf32>
    %cst_91 = arith.constant 1.000000e+00 : f32
    %190 = vector.broadcast %cst_91 : f32 to vector<8x128xf32>
    %191 = arith.addf %190, %189 : vector<8x128xf32>
    %192 = arith.mulf %186, %191 : vector<8x128xf32>
    %193 = arith.truncf %192 : vector<8x128xf32> to vector<8x128xbf16>
    %c0_92 = arith.constant 0 : index
    %c0_93 = arith.constant 0 : index
    %194 = vector.load %arg12[%c0_92, %c0_93] : memref<128x32xbf16, #tpu.memory_space<vmem>>, vector<128x32xbf16>
    %cst_94 = arith.constant dense<0.000000e+00> : vector<8x32xf32>
    %195 = tpu.matmul %193, %194, %cst_94 {dimension_numbers = #tpu.dot_dimension_numbers<[1], [0], [0], [1], [0, 0, 1, 1], [], []>} : vector<8x128xbf16>, vector<128x32xbf16>, vector<8x32xf32> -> vector<8x32xf32>
    %c0_95 = arith.constant 0 : index
    %c0_96 = arith.constant 0 : index
    %196 = vector.load %arg13[%c0_95, %c0_96] : memref<1x32xf32, #tpu.memory_space<vmem>>, vector<1x32xf32>
    %197 = vector.shape_cast %196 : vector<1x32xf32> to vector<32xf32>
    %198 = vector.shape_cast %197 : vector<32xf32> to vector<1x32xf32>
    %199 = vector.broadcast %198 : vector<1x32xf32> to vector<8x32xf32>
    %200 = arith.addf %195, %199 : vector<8x32xf32>
    %201 = arith.addf %148, %200 : vector<8x32xf32>
    %202 = vector.shape_cast %201 : vector<8x32xf32> to vector<1x8x32xf32>
    %c0_97 = arith.constant 0 : index
    %c0_98 = arith.constant 0 : index
    %c0_99 = arith.constant 0 : index
    %203 = vector.load %arg14[%c0_97, %c0_98, %c0_99] : memref<1x8x32xf32, #tpu.memory_space<vmem>>, vector<1x8x32xf32>
    tpu.vector_store %arg14[%c0_97, %c0_98, %c0_99], %202 {strides = array<i32>} : memref<1x8x32xf32, #tpu.memory_space<vmem>>, vector<1x8x32xf32>,
    return
  }
  func.func @transform_0(%arg0: i32) -> (i32, i32, i32) {
    %c0_i32 = arith.constant 0 : i32
    %c0_i32_0 = arith.constant 0 : i32
    %c0_i32_1 = arith.constant 0 : i32
    return %arg0, %c0_i32, %c0_i32_0 : i32, i32, i32
  }
  func.func @transform_1(%arg0: i32) -> (i32, i32) {
    %c0_i32 = arith.constant 0 : i32
    %c0_i32_0 = arith.constant 0 : i32
    %c0_i32_1 = arith.constant 0 : i32
    return %c0_i32, %c0_i32_0 : i32, i32
  }
  func.func @transform_2(%arg0: i32) -> (i32, i32) {
    %c0_i32 = arith.constant 0 : i32
    %c0_i32_0 = arith.constant 0 : i32
    %c0_i32_1 = arith.constant 0 : i32
    return %c0_i32, %c0_i32_0 : i32, i32
  }
  func.func @transform_3(%arg0: i32) -> (i32, i32) {
    %c0_i32 = arith.constant 0 : i32
    %c0_i32_0 = arith.constant 0 : i32
    %c0_i32_1 = arith.constant 0 : i32
    return %c0_i32, %c0_i32_0 : i32, i32
  }
  func.func @transform_4(%arg0: i32) -> (i32, i32) {
    %c0_i32 = arith.constant 0 : i32
    %c0_i32_0 = arith.constant 0 : i32
    %c0_i32_1 = arith.constant 0 : i32
    return %c0_i32, %c0_i32_0 : i32, i32
  }
  func.func @transform_5(%arg0: i32) -> (i32, i32) {
    %c0_i32 = arith.constant 0 : i32
    %c0_i32_0 = arith.constant 0 : i32
    %c0_i32_1 = arith.constant 0 : i32
    return %c0_i32, %c0_i32_0 : i32, i32
  }
  func.func @transform_6(%arg0: i32) -> (i32, i32) {
    %c0_i32 = arith.constant 0 : i32
    %c0_i32_0 = arith.constant 0 : i32
    %c0_i32_1 = arith.constant 0 : i32
    return %c0_i32, %c0_i32_0 : i32, i32
  }
  func.func @transform_7(%arg0: i32) -> (i32, i32) {
    %c0_i32 = arith.constant 0 : i32
    %c0_i32_0 = arith.constant 0 : i32
    %c0_i32_1 = arith.constant 0 : i32
    return %c0_i32, %c0_i32_0 : i32, i32
  }
  func.func @transform_8(%arg0: i32) -> (i32, i32) {
    %c0_i32 = arith.constant 0 : i32
    %c0_i32_0 = arith.constant 0 : i32
    %c0_i32_1 = arith.constant 0 : i32
    return %c0_i32, %c0_i32_0 : i32, i32
  }
  func.func @transform_9(%arg0: i32) -> (i32, i32) {
    %c0_i32 = arith.constant 0 : i32
    %c0_i32_0 = arith.constant 0 : i32
    %c0_i32_1 = arith.constant 0 : i32
    return %c0_i32, %c0_i32_0 : i32, i32
  }
  func.func @transform_10(%arg0: i32) -> (i32, i32) {
    %c0_i32 = arith.constant 0 : i32
    %c0_i32_0 = arith.constant 0 : i32
    %c0_i32_1 = arith.constant 0 : i32
    return %c0_i32, %c0_i32_0 : i32, i32
  }
  func.func @transform_11(%arg0: i32) -> (i32, i32) {
    %c0_i32 = arith.constant 0 : i32
    %c0_i32_0 = arith.constant 0 : i32
    %c0_i32_1 = arith.constant 0 : i32
    return %c0_i32, %c0_i32_0 : i32, i32
  }
  func.func @transform_12(%arg0: i32) -> (i32, i32) {
    %c0_i32 = arith.constant 0 : i32
    %c0_i32_0 = arith.constant 0 : i32
    %c0_i32_1 = arith.constant 0 : i32
    return %c0_i32, %c0_i32_0 : i32, i32
  }
  func.func @transform_13(%arg0: i32) -> (i32, i32, i32) {
    %c0_i32 = arith.constant 0 : i32
    %c0_i32_0 = arith.constant 0 : i32
    %c0_i32_1 = arith.constant 0 : i32
    return %arg0, %c0_i32, %c0_i32_0 : i32, i32, i32
  }
}

</mosaic_0001>

<bundles_post_ra>
// kernel: tpu_custom_call.1
= control target key start
LH: loop header
LB: loop body
LE: loop exit
PB: predicated region body
PF: predicated region fallthrough
CT: control target
= control target key end

     0   :  { %s2126_s0 = inlined_call_operand.vmem [shape: f32[2,8,32], index: 0, kind: input, shape index: {}]   ;;  %s2127_s1 = inlined_call_operand.vmem [shape: f32[1,32], index: 1, kind: input, shape index: {}]   ;;  %s2128_s2 = inlined_call_operand.vmem [shape: f32[1,32], index: 2, kind: input, shape index: {}]   ;;  %s2129_s3 = inlined_call_operand.vmem [shape: bf16[32,96], index: 3, kind: input, shape index: {}]   ;;  %s2130_s4 = inlined_call_operand.vmem [shape: f32[1,96], index: 4, kind: input, shape index: {}]   ;;  %s2131_s5 = inlined_call_operand.vmem [shape: bf16[32,32], index: 5, kind: input, shape index: {}]   ;;  %s2132_s6 = inlined_call_operand.vmem [shape: f32[1,32], index: 6, kind: input, shape index: {}]   ;;  %s2133_s7 = inlined_call_operand.vmem [shape: f32[1,32], index: 7, kind: input, shape index: {}]   ;;  %s2134_s8 = inlined_call_operand.vmem [shape: f32[1,32], index: 8, kind: input, shape index: {}]   ;;  %s2135_s9 = inlined_call_operand.vmem [shape: bf16[32,128], index: 9, kind: input, shape index: {}]   ;;  %s2136_s10 = inlined_call_operand.vmem [shape: f32[1,128], index: 10, kind: input, shape index: {}]   ;;  %s2137_s11 = inlined_call_operand.vmem [shape: bf16[128,32], index: 11, kind: input, shape index: {}]   ;;  %s2138_s12 = inlined_call_operand.vmem [shape: f32[1,32], index: 12, kind: input, shape index: {}]   ;;  %s2139_s13 = inlined_call_operand.hbm [shape: f32[2,8,32], index: 13, kind: output, shape index: {}]  }
   0x1   :  { %2140 = sst [smem:[#allocation9_spill]] %s2126_s0 }
   0x2   :  { %2141 = sst [smem:[#allocation10_spill]] %s2127_s1 }
   0x3   :  { %2142 = sst [smem:[#allocation11_spill]] %s2128_s2 }
   0x4   :  { %18 = vsyncpa [#allocation7], 0 }
   0x5   :  { %20 = vsyncpa [#allocation7 + $0x1], 0  ;;  %s1842_s25 = smov 0   ;;  %s1844_s26 = smov 0  }
   0x6   :  { %s1846_s27 = smov 0   ;;  %s1848_s28 = smov 0  }
   0x7 LB: > { %s1863_s29 = sadd.s32 4294967295, %s1753_s28   ;;  %s1425_s30 = sadd.s32 4294967294, %s1753_s28   ;;  %s1753_s28 = sphi %s1848_s28, %s2151_s28   ;;  %s1749_s27 = sphi %s1846_s27, %s2150_s27   ;;  %s1745_s26 = sphi %s1844_s26, %s2149_s26   ;;  %s1741_s25 = sphi %s1842_s25, %s2148_s25  }
   0x8   : > { %s1867_s14 = sadd.s32 1, %s1753_s28   ;;  %s311_s15 = sadd.s32 1, %s1749_s27 }
   0x9   : > { %s308_s16 = ssub.s32 %s1753_s28, %s1867_s14  ;;  %p321_p0 = scmp.ne.s32.totalorder %s1749_s27, %s1745_s26 }
   0xa   : > { %p309_p1 = scmp.eq.s32.totalorder %s308_s16, 0  ;;  %p322_p2 = scmp.eq.s32.totalorder %s1863_s29, 1 }
   0xb   : > { %p327_p3 = scmp.ne.s32.totalorder %s1745_s26, %s1741_s25  ;;  %p328_p4 = scmp.eq.s32.totalorder %s1425_s30, 1 }
   0xc   : > { %s1878_s17 = scalar_select %p309_p1, %s1749_s27, %s311_s15  }
   0xd   : > { %p1880_p5 = por %p322_p2, %p321_p0  ;;  %p1884_p6 = por %p328_p4, %p327_p3 }
   0xe   : > { %p1428_p7 = scmp.ge.s32.totalorder %s1753_s28, 1  ;;  %p389_p8 = scmp.lt.s32.totalorder %s1753_s28, 3 }
  0x10   : > { %p390_p9 = pnand %p1428_p7, %p389_p8 }
  0x11   : > { %p432_p10 = scmp.lt.s32.totalorder (!%p390_p9), %s1863_s29, 1  ;;  %s2145_s0 = sld [smem:[#allocation9_spill]] (!%p390_p9) }
  0x12   : > { %393 = sbr.rel (%p390_p9) target bundleno = 2451 (0x993), region = 72  ;;  %s2146_s1 = sld [smem:[#allocation10_spill]] (!%p390_p9) }
  0x13   : > { %s2147_s2 = sld [smem:[#allocation11_spill]] (!%p390_p9)  ;;  %s1757_s16 = smov (!%p390_p9), 80  }
  0x14   : > { %s1760_s22 = smov (!%p390_p9), 120   ;;  %s1761_s23 = smov (!%p390_p9), 72  }
  0x15   : > { %s1763_s30 = smov (!%p390_p9), 104   ;;  %s1764_s15 = smov (!%p390_p9), 64  }
  0x17   : > { %s433_s20 = scalar_select %p432_p10, %s1863_s29, 1  ;;  %vm440_vm0 = vcmask 261120   ;;  %v1657_v7 = vld [vmem:[%s2129_s3 + $0x8] sm:$0xff]   ;;  %v1755_v8 = vmov 0.0   ;;  %vm1756_vm1 = vmmov 0   ;;  %v1658_v9 = vld [vmem:[%s2129_s3] sm:$0xff]   ;;  %v607_v46 = vlaneseq }
  0x18   : > { %1510 = vmatprep.subr.bf16.mxu0 %v1755_v8  ;;  %1514 = vmatprep.mubr.msk.bf16.mxu0 %vm1756_vm1, %v1755_v8  ;;  %v1431_v14 = vld [vmem:[%s2146_s1] ss:$0 sm:$0xff]  ;;  %vm537_vm2 = vcmask 60416   ;;  %vm612_vm3 = vcmask 64512   ;;  %vm858_vm5 = vcmask 1043456   ;;  %vm1049_vm6 = vcmask 126016  }
  0x19   : > { %s1430_s21 = sshll.u32 %s433_s20, 3  ;;  %1511 = vmatpush3.bf16.msra.mxu0 %v1657_v7  ;;  %1530 = vmatprep.subr.bf16.mxu1 %v1755_v8  ;;  %v1432_v16 = vld [vmem:[%s2147_s2] ss:$0 sm:$0xff]  ;;  %s1758_s20 = smov 96   ;;  %v608_v47 = vshrl.u32 %v607_v46, 7  ;;  %v610_v48 = vand.u32 127, %v607_v46 }
  0x1a   : > { %s435_s24 = scalar_lea.vmem %s2145_s0, %s1430_s21  ;;  %1512 = vmatprep.subr.bf16.mxu0 %v1755_v8  ;;  %1532 = vmatprep.mubr.msk.bf16.mxu1 %vm1756_vm1, %v1755_v8  ;;  %v1433_v20 = vld [vmem:[%s2130_s4] ss:$0 sm:$0xff]  ;;  %s1759_s21 = smov 88   ;;  %vm1058_vm7 = vcmask 191616   ;;  %vm1067_vm8 = vcmask 257216  }
  0x1b   : > { %v1895_v0 = vld [vmem:[%s435_s24] sm:$0xff]  ;;  %s1762_s24 = smov 112   ;;  %vm611_vm4 = vcmp.le.s32.totalorder %v610_v48, %v608_v47 }
  0x1c   : > { %v441_v1 = vsel %vm440_vm0, %v1895_v0, 0.0 }
  0x1d   : > { %442 = vadd.xlane.f32.xlu0 %v441_v1  ;;  %1513 = vmatpush3.bf16.msra.mxu0 %v1658_v9 }
  0x1e   : > { %1518 = vmatprep.subr.bf16.mxu0 %v1755_v8 }
  0xa6   : > { %v443_v2 = vpop.xlane.xlu0 %442 }
  0xa7   : > { %v445_v3 = vmul.f32 0.03125, %v443_v2 }
  0xa9   : > { %v446_v4 = vsub.f32 %v1895_v0, %v445_v3 }
  0xab   : > { %v447_v5 = vmul.f32 %v446_v4, %v446_v4 }
  0xad   : > { %v448_v6 = vsel %vm440_vm0, %v447_v5, 0.0 }
  0xae   : > { %449 = vadd.xlane.f32.xlu0 %v448_v6 }
 0x137   : > { %v450_v10 = vpop.xlane.xlu0 %449 }
 0x138   : > { %v451_v11 = vmul.f32 0.03125, %v450_v10 }
 0x13a   : > { %v452_v12 = vadd.f32 1e-05, %v451_v11 }
 0x13c   : > { %1671 = vrsqrt.f32 %v452_v12 }
 0x149   : > { %v1672_v13 = vpop.eup %1671 }
 0x14a   : > { %v454_v15 = vmul.f32 %v1672_v13, %v446_v4 }
 0x14c   : > { %v461_v17 = vmul.f32 %v1431_v14, %v454_v15 }
 0x14e   : > { %v468_v18 = vadd.f32 %v1432_v16, %v461_v17 }
 0x150   : > { %v469_v19 = vpack.c.bf16 %v468_v18, %v468_v18 }
 0x152   : > { %1515 = vmatmul.mubr.msk.bf16.vlgmr.msra.gmra.mxu0 %vm440_vm0, %v469_v19 }
 0x153   : > { %1520 = vmatprep.mubr.msk.bf16.mxu0 %vm1756_vm1, %v1755_v8 }
 0x212   : > { %v530_v21 = vpop.f32.mrf.mxu0 }
 0x213   : > { %v531_v22 = vadd.f32 %v1433_v20, %v530_v21 }
 0x214   : > { %v1516_v23 = vpop.f32.mrf.mxu0 }
 0x215   : > { %v1927_v24 = vpack.c.bf16 %v531_v22, %v531_v22 }
 0x216   : > { %v533_v25 = vpop.f32.mrf.mxu0 }
 0x217   : > { %570 = vrot.lane.b32.xlu0 %v1927_v24, %s1757_s16  ;;  %542 = vrot.lane.b32.xlu1 %v1927_v24, %s1758_s20  ;;  %538 = vst.msk [vmem:[#allocation2] sm:$0xf] %vm537_vm2, %v1927_v24  ;;  %s1765_s16 = smov 48   ;;  %s1766_s20 = smov 40  }
 0x218   : > { %v1517_v26 = vpop.f32.mrf.mxu0 }
 0x21b   : > { %555 = vrot.lane.b32.xlu1 %v1927_v24, %s1759_s21  ;;  %s1767_s21 = smov 56  }
 0x21e   : > { %v595_v38 = vld [vmem:[#allocation2] sm:$0xf] }
 0x21f   : > { %550 = vrot.lane.b32.xlu1 %v1927_v24, %s1760_s22  ;;  %s1768_s22 = smov 16  }
 0x223   : > { %585 = vrot.lane.b32.xlu1 %v1927_v24, %s1761_s23 }
 0x227   : > { %565 = vrot.lane.b32.xlu1 %v1927_v24, %s1762_s24 }
 0x22b   : > { %580 = vrot.lane.b32.xlu1 %v1927_v24, %s1763_s30  ;;  %s429_s30 = sand.u32 1, %s1745_s26  }
 0x289   : > { %v571_v27 = vpop.permute.xlu0 %570  ;;  %v543_v28 = vpop.permute.xlu1 %542 }
 0x28a   : > { %574 = vst.msk [vmem:[#allocation3 + $0x8] sm:$0xf] %vm537_vm2, %v571_v27  ;;  %545 = vst.msk [vmem:[#allocation3] sm:$0xf] %vm537_vm2, %v543_v28 }
 0x28d   : > { %v556_v29 = vpop.permute.xlu1 %555 }
 0x28e   : > { %559 = vst.msk [vmem:[#allocation3 + $0x4] sm:$0xf] %vm537_vm2, %v556_v29 }
 0x291   : > { %v551_v30 = vpop.permute.xlu1 %550  ;;  %v599_v31 = vld [vmem:[#allocation3] sm:$0xf]  ;;  %v601_v32 = vld [vmem:[#allocation3 + $0x8] sm:$0xf] }
 0x292   : > { %554 = vst.msk [vmem:[#allocation2 + $0x4] sm:$0xf] %vm537_vm2, %v551_v30  ;;  %v617_v33 = vsel %vm612_vm3, %v599_v31, 0  ;;  %v709_v34 = vsel %vm612_vm3, %v601_v32, 0 }
 0x293   : > { %1519 = vmatpush3.bf16.xpose.msra.mxu0 %v617_v33  ;;  %1531 = vmatpush3.bf16.xpose.msra.mxu1 %v709_v34 }
 0x294   : > { %1524 = vmatprep.subr.bf16.mxu0 %v1755_v8  ;;  %1542 = vmatprep.subr.bf16.mxu1 %v1755_v8 }
 0x295   : > { %v586_v35 = vpop.permute.xlu1 %585  ;;  %v600_v36 = vld [vmem:[#allocation3 + $0x4] sm:$0xf] }
 0x296   : > { %589 = vst.msk [vmem:[#allocation3 + $0xc] sm:$0xf] %vm537_vm2, %v586_v35  ;;  %v663_v39 = vsel %vm612_vm3, %v600_v36, 0 }
 0x299   : > { %v566_v37 = vpop.permute.xlu1 %565  ;;  %v596_v42 = vld [vmem:[#allocation2 + $0x4] sm:$0xf] }
 0x29a   : > { %569 = vst.msk [vmem:[#allocation2 + $0x8] sm:$0xf] %vm537_vm2, %v566_v37  ;;  %1521 = vmatmul.mubr.msk.bf16.vlgmr.msra.gmra.mxu0 %vm612_vm3, %v595_v38 }
 0x29b   : > { %1525 = vmatpush3.bf16.xpose.msra.mxu0 %v663_v39  ;;  %1526 = vmatprep.mubr.msk.bf16.mxu0 %vm1756_vm1, %v1755_v8 }
 0x29c   : > { %1536 = vmatprep.subr.bf16.mxu0 %v1755_v8 }
 0x29d   : > { %v581_v40 = vpop.permute.xlu1 %580  ;;  %v602_v41 = vld [vmem:[#allocation3 + $0xc] sm:$0xf] }
 0x29e   : > { %584 = vst.msk [vmem:[#allocation2 + $0xc] sm:$0xf] %vm537_vm2, %v581_v40  ;;  %v755_v44 = vsel %vm612_vm3, %v602_v41, 0 }
 0x2a1   : > { %v597_v43 = vld [vmem:[#allocation2 + $0x8] sm:$0xf] }
 0x2a2   : > { %1527 = vmatmul.mubr.msk.bf16.vlgmr.msra.gmra.mxu0 %vm612_vm3, %v596_v42  ;;  %1533 = vmatmul.mubr.msk.bf16.vlgmr.msra.gmra.mxu1 %vm612_vm3, %v597_v43 }
 0x2a3   : > { %1537 = vmatpush3.bf16.xpose.msra.mxu0 %v755_v44  ;;  %1538 = vmatprep.mubr.msk.bf16.mxu0 %vm1756_vm1, %v1755_v8 }
 0x2a4   : > { %1544 = vmatprep.mubr.msk.bf16.mxu1 %vm1756_vm1, %v1755_v8  ;;  %1548 = vmatprep.subr.bf16.mxu0 %v1755_v8 }
 0x2a5   : > { %v598_v45 = vld [vmem:[#allocation2 + $0xc] sm:$0xf] }
 0x2aa   : > { %1539 = vmatmul.mubr.msk.bf16.vlgmr.msra.gmra.mxu0 %vm612_vm3, %v598_v45 }
 0x2ab   : > { %1550 = vmatprep.mubr.msk.bf16.mxu0 %vm1756_vm1, %v1755_v8 }
 0x35a   : > { %v653_v49 = vpop.f32.mrf.mxu0 }
 0x35b   : > { %v797_v50 = vmul.f32 0.35355338, %v653_v49 }
 0x35c   : > { %v1522_v51 = vpop.f32.mrf.mxu0 }
 0x35d   : > { %v803_v52 = vsel %vm611_vm4, %v797_v50, -1e+30 }
 0x35e   : > { %v656_v53 = vpop.f32.mrf.mxu0  ;;  %v807_v54 = vsel %vm612_vm3, %v803_v52, -inf }
 0x35f   : > { %808 = vmax.xlane.f32.xlu1 %v807_v54 }
 0x360   : > { %v1523_v55 = vpop.f32.mrf.mxu0 }
 0x362   : > { %v699_v56 = vpop.f32.mrf.mxu0  ;;  %v745_v57 = vpop.f32.mrf.mxu1 }
 0x363   : > { %v798_v58 = vmul.f32 0.35355338, %v699_v56  ;;  %v799_v59 = vmul.f32 0.35355338, %v745_v57 }
 0x364   : > { %v1528_v60 = vpop.f32.mrf.mxu0  ;;  %v1534_v61 = vpop.f32.mrf.mxu1 }
 0x365   : > { %v805_v62 = vsel %vm611_vm4, %v799_v59, -1e+30  ;;  %v804_v63 = vsel %vm611_vm4, %v798_v58, -1e+30 }
 0x366   : > { %v702_v1 = vpop.f32.mrf.mxu0  ;;  %v748_v2 = vpop.f32.mrf.mxu1  ;;  %v813_v3 = vsel %vm612_vm3, %v805_v62, -inf  ;;  %v810_v4 = vsel %vm612_vm3, %v804_v63, -inf }
 0x367   : > { %814 = vmax.xlane.f32.xlu1 %v813_v3  ;;  %811 = vmax.xlane.f32.xlu0 %v810_v4 }
 0x368   : > { %v1529_v5 = vpop.f32.mrf.mxu0  ;;  %v1535_v6 = vpop.f32.mrf.mxu1 }
 0x36a   : > { %v791_v7 = vpop.f32.mrf.mxu0 }
 0x36b   : > { %v800_v9 = vmul.f32 0.35355338, %v791_v7 }
 0x36c   : > { %v1540_v10 = vpop.f32.mrf.mxu0 }
 0x36d   : > { %v806_v11 = vsel %vm611_vm4, %v800_v9, -1e+30  ;;  %v1659_v10 = vld [vmem:[%s2131_s5 + $0x8] sm:$0xff]  }
 0x36e   : > { %v794_v12 = vpop.f32.mrf.mxu0  ;;  %v816_v13 = vsel %vm612_vm3, %v806_v11, -inf }
 0x36f   : > { %817 = vmax.xlane.f32.xlu0 %v816_v13  ;;  %v1660_v13 = vld [vmem:[%s2131_s5] sm:$0xff]  }
 0x370   : > { %v1541_v14 = vpop.f32.mrf.mxu0 }
 0x378   : > { %546 = vrot.lane.b32.xlu1 %v1927_v24, %s1764_s15  ;;  %s1429_s15 = sshll.u32 %s429_s30, 3 }
 0x3e8   : > { %v809_v15 = vpop.xlane.xlu1 %808 }
 0x3e9   : > { %v819_v16 = vsub.f32 %v803_v52, %v809_v15 }
 0x3eb   : > { %v823_v17 = vmul.f32 1.442695, %v819_v16 }
 0x3ed   : > { %1673 = vpow2.f32 %v823_v17 }
 0x3f0   : > { %v815_v18 = vpop.xlane.xlu1 %814  ;;  %v812_v19 = vpop.xlane.xlu0 %811 }
 0x3f1   : > { %v821_v20 = vsub.f32 %v805_v62, %v815_v18  ;;  %v820_v21 = vsub.f32 %v804_v63, %v812_v19 }
 0x3f3   : > { %v827_v22 = vmul.f32 1.442695, %v821_v20  ;;  %v825_v23 = vmul.f32 1.442695, %v820_v21 }
 0x3f4   : > { %v547_v25 = vpop.permute.xlu1 %546 }
 0x3f5   : > { %1675 = vpow2.f32 %v827_v22  ;;  %549 = vst.msk [vmem:[#allocation4] sm:$0xf] %vm537_vm2, %v547_v25 }
 0x3f6   : > { %1677 = vpow2.f32 %v825_v23 }
 0x3f8   : > { %v818_v26 = vpop.xlane.xlu0 %817 }
 0x3f9   : > { %v822_v27 = vsub.f32 %v806_v11, %v818_v26 }
 0x3fa   : > { %v1674_v28 = vpop.eup %1673 }
 0x3fb   : > { %v829_v29 = vmul.f32 1.442695, %v822_v27  ;;  %v831_v30 = vsel %vm612_vm3, %v1674_v28, 0.0 }
 0x3fc   : > { %832 = vadd.xlane.f32.xlu1 %v831_v30  ;;  %v603_v31 = vld [vmem:[#allocation4] sm:$0xf] }
 0x3fd   : > { %1679 = vpow2.f32 %v829_v29  ;;  %v860_v32 = vsel %vm858_vm5, %v603_v31, 0 }
 0x3fe   : > { %1543 = vmatpush3.bf16.msra.mxu1 %v860_v32 }
 0x3ff   : > { %1554 = vmatprep.subr.bf16.mxu1 %v1755_v8 }
 0x402   : > { %v1676_v33 = vpop.eup %1675 }
 0x403   : > { %v1678_v34 = vpop.eup %1677  ;;  %v837_v35 = vsel %vm612_vm3, %v1676_v33, 0.0 }
 0x404   : > { %838 = vadd.xlane.f32.xlu1 %v837_v35  ;;  %v834_v36 = vsel %vm612_vm3, %v1678_v34, 0.0 }
 0x405   : > { %835 = vadd.xlane.f32.xlu0 %v834_v36 }
 0x40a   : > { %v1680_v37 = vpop.eup %1679 }
 0x40b   : > { %v840_v38 = vsel %vm612_vm3, %v1680_v37, 0.0 }
 0x40c   : > { %841 = vadd.xlane.f32.xlu0 %v840_v38 }
 0x415   : > { %575 = vrot.lane.b32.xlu1 %v1927_v24, %s1765_s16  ;;  %s1769_s16 = smov 8  }
 0x419   : > { %590 = vrot.lane.b32.xlu1 %v1927_v24, %s1766_s20  ;;  %s1770_s20 = smov 24  }
 0x422   : > { %560 = vrot.lane.b32.xlu0 %v1927_v24, %s1767_s21  ;;  %s1469_s21 = sshll.u32 %s1863_s29, 7  ;;  %s1353_s29 = scalar_lea.sflag [#allocation7], %s429_s30 }
 0x423   : > { %s2084_s1 = scalar_lea.hbm %s2139_s13, %s1469_s21 }
 0x485   : > { %v833_v39 = vpop.xlane.xlu1 %832 }
 0x486   : > { %1681 = vrcp.f32 %v833_v39 }
 0x48d   : > { %v839_v40 = vpop.xlane.xlu1 %838 }
 0x48e   : > { %1683 = vrcp.f32 %v839_v40  ;;  %v836_v41 = vpop.xlane.xlu0 %835 }
 0x48f   : > { %1685 = vrcp.f32 %v836_v41  ;;  %v1661_v41 = vld [vmem:[%s2135_s9 + $0x8] sm:$0xff]  }
 0x491   : > { %v576_v42 = vpop.permute.xlu1 %575 }
 0x492   : > { %579 = vst.msk [vmem:[#allocation4 + $0x8] sm:$0xf] %vm537_vm2, %v576_v42  ;;  %v1663_v42 = vld [vmem:[%s2137_s11 + $0x38] sm:$0xff]  }
 0x493   : > { %v1682_v43 = vpop.eup %1681 }
 0x494   : > { %v847_v44 = vmul.f32 %v1682_v43, %v1674_v28  ;;  %v1449_v28 = vld [vmem:[%s2132_s6] ss:$0 sm:$0xff]  ;;  %v1664_v43 = vld [vmem:[%s2137_s11 + $0x30] sm:$0xff]  }
 0x495   : > { %v591_v45 = vpop.permute.xlu1 %590  ;;  %v842_v46 = vpop.xlane.xlu0 %841 }
 0x496   : > { %594 = vst.msk [vmem:[#allocation4 + $0xc] sm:$0xf] %vm537_vm2, %v591_v45  ;;  %v851_v47 = vpack.c.bf16 %v847_v44, %v847_v44  ;;  %1687 = vrcp.f32 %v842_v46 }
 0x498   : > { %1545 = vmatmul.mubr.msk.bf16.vlgmr.msra.gmra.mxu1 %vm612_vm3, %v851_v47 }
 0x499   : > { %v561_v24 = vpop.permute.xlu0 %560  ;;  %v605_v48 = vld [vmem:[#allocation4 + $0x8] sm:$0xf]  ;;  %1556 = vmatprep.mubr.msk.bf16.mxu1 %vm1756_vm1, %v1755_v8 }
 0x49a   : > { %564 = vst.msk [vmem:[#allocation4 + $0x4] sm:$0xf] %vm537_vm2, %v561_v24  ;;  %v952_v49 = vsel %vm858_vm5, %v605_v48, 0  ;;  %v1453_v24 = vld [vmem:[%s2133_s7] ss:$0 sm:$0xff] }
 0x49b   : > { %v1684_v50 = vpop.eup %1683  ;;  %1555 = vmatpush3.bf16.msra.mxu1 %v952_v49  ;;  %v1454_v49 = vld [vmem:[%s2134_s8] ss:$0 sm:$0xff] }
 0x49c   : > { %v849_v51 = vmul.f32 %v1684_v50, %v1676_v33  ;;  %1566 = vmatprep.subr.bf16.mxu1 %v1755_v8  ;;  %v1686_v52 = vpop.eup %1685 }
 0x49d   : > { %v848_v54 = vmul.f32 %v1686_v52, %v1678_v34  ;;  %v606_v57 = vld [vmem:[#allocation4 + $0xc] sm:$0xf] }
 0x49e   : > { %v853_v53 = vpack.c.bf16 %v849_v51, %v849_v51  ;;  %v998_v60 = vsel %vm858_vm5, %v606_v57, 0  ;;  %v1669_v57 = vld [vmem:[%s2137_s11 + $0x8] sm:$0xff]  }
 0x49f   : > { %v852_v58 = vpack.c.bf16 %v848_v54, %v848_v54  ;;  %v1666_v54 = vld [vmem:[%s2137_s11 + $0x20] sm:$0xff]  }
 0x4a0   : > { %1557 = vmatmul.mubr.msk.bf16.vlgmr.msra.gmra.mxu1 %vm612_vm3, %v853_v53  ;;  %v1665_v53 = vld [vmem:[%s2137_s11 + $0x28] sm:$0xff]  }
 0x4a1   : > { %v604_v55 = vld [vmem:[#allocation4 + $0x4] sm:$0xf]  ;;  %1570 = vmatprep.mubr.msk.bf16.mxu1 %vm1756_vm1, %v1755_v8  ;;  %1567 = vmatpush3.bf16.msra.mxu1 %v1659_v10 }
 0x4a2   : > { %v906_v56 = vsel %vm858_vm5, %v604_v55, 0  ;;  %1568 = vmatprep.subr.bf16.mxu1 %v1755_v8  ;;  %v1667_v55 = vld [vmem:[%s2137_s11 + $0x18] sm:$0xff]  }
 0x4a3   : > { %1549 = vmatpush3.bf16.msra.mxu0 %v906_v56  ;;  %v1688_v59 = vpop.eup %1687  ;;  %v1668_v56 = vld [vmem:[%s2137_s11 + $0x10] sm:$0xff]  }
 0x4a4   : > { %1560 = vmatprep.subr.bf16.mxu0 %v1755_v8  ;;  %v850_v61 = vmul.f32 %v1688_v59, %v1680_v37  ;;  %v1455_v59 = vld [vmem:[%s2136_s10] ss:$0 sm:$0xff] }
 0x4a5   : > { %1569 = vmatpush3.bf16.msra.mxu1 %v1660_v13 }
 0x4a6   : > { %1551 = vmatmul.mubr.msk.bf16.vlgmr.msra.gmra.mxu0 %vm612_vm3, %v852_v58  ;;  %v854_v62 = vpack.c.bf16 %v850_v61, %v850_v61  ;;  %1582 = vmatprep.subr.bf16.mxu1 %v1755_v8  ;;  %v1670_v58 = vld [vmem:[%s2137_s11] sm:$0xff]  }
 0x4a7   : > { %1561 = vmatpush3.bf16.msra.mxu0 %v998_v60  ;;  %1562 = vmatprep.mubr.msk.bf16.mxu0 %vm1756_vm1, %v1755_v8 }
 0x4a8   : > { %1574 = vmatprep.subr.bf16.mxu0 %v1755_v8 }
 0x4ae   : > { %1563 = vmatmul.mubr.msk.bf16.vlgmr.msra.gmra.mxu0 %vm612_vm3, %v854_v62 }
 0x4af   : > { %1578 = vmatprep.mubr.msk.bf16.mxu0 %vm1756_vm1, %v1755_v8  ;;  %1575 = vmatpush3.bf16.msra.mxu0 %v1661_v41 }
 0x4b0   : > { %1576 = vmatprep.subr.bf16.mxu0 %v1755_v8 }
 0x558   : > { %v896_v63 = vpop.f32.mrf.mxu1 }
 0x559   : > { %v1040_v1 = vpack.c.bf16 %v896_v63, %v896_v63 }
 0x55a   : > { %v1546_v2 = vpop.f32.mrf.mxu1 }
 0x55b   : > { %1041 = vst.msk [vmem:[#allocation5] sm:$0xf] %vm537_vm2, %v1040_v1 }
 0x55c   : > { %v899_v3 = vpop.f32.mrf.mxu1 }
 0x55e   : > { %v1547_v4 = vpop.f32.mrf.mxu1 }
 0x560   : > { %v988_v5 = vpop.f32.mrf.mxu1 }
 0x561   : > { %v1474_v6 = vpack.c.bf16 %v988_v5, %v988_v5 }
 0x562   : > { %v1558_v7 = vpop.f32.mrf.mxu1 }
 0x563   : > { %1055 = vrot.lane.b32.xlu1 %v1474_v6, %s1768_s22  ;;  %v1459_v7 = vld [vmem:[%s2138_s12] ss:$0 sm:$0xff]  ;;  %s431_s22 = scalar_lea.vmem [#allocation6], %s1429_s15 }
 0x564   : > { %v991_v9 = vpop.f32.mrf.mxu1  ;;  %s1366_s23 = sshll.u32 %s431_s22, 4  ;;  %s2086_s23 = int_to_ptr.vmem [resolvable:$true] %s1366_s23 }
 0x565   : > { %s1693_s15 = scalar_lea.vmem %s2086_s23, 128 }
 0x566   : > { %v942_v11 = vpop.f32.mrf.mxu0  ;;  %v1559_v12 = vpop.f32.mrf.mxu1  ;;  %p1694_p11 = scmp.ne.s32.totalorder %s2086_s23, %s1693_s15 }
 0x567   : > { %v1473_v14 = vpack.c.bf16 %v942_v11, %v942_v11 }
 0x568   : > { %v1552_v15 = vpop.f32.mrf.mxu0  ;;  %p1695_p12 = pnand %p1694_p11, %p1880_p5 }
 0x569   : > { %1046 = vrot.lane.b32.xlu0 %v1473_v14, %s1769_s16  ;;  %s1771_s16 = smov [#allocation6]  }
 0x56a   : > { %v945_v16 = vpop.f32.mrf.mxu0  ;;  %p1696_p13 = pneg %p1695_p12 }
 0x56c   : > { %v1553_v17 = vpop.f32.mrf.mxu0 }
 0x56e   : > { %v1034_v18 = vpop.f32.mrf.mxu0 }
 0x56f   : > { %v1475_v19 = vpack.c.bf16 %v1034_v18, %v1034_v18 }
 0x570   : > { %v1564_v20 = vpop.f32.mrf.mxu0 }
 0x571   : > { %1064 = vrot.lane.b32.xlu0 %v1475_v19, %s1770_s20  ;;  %s1697_s20 = sshll.u32 %s1771_s16, 4  ;;  %s1698_s20 = int_to_ptr.vmem [resolvable:$false] %s1697_s20 }
 0x572   : > { %v1037_v21 = vpop.f32.mrf.mxu0  ;;  %s1699_s0 = scalar_lea.vmem %s1698_s20, 256  ;;  %p1700_p0 = scmp.lt.s32.totalorder %s2086_s23, %s1698_s20 }
 0x573   : > { %p1701_p1 = scmp.lt.s32.totalorder %s1699_s0, %s1693_s15 }
 0x574   : > { %v1565_v22 = vpop.f32.mrf.mxu0 }
 0x575   : > { %p1702_p2 = por %p1701_p1, %p1700_p0 }
 0x577   : > { %p1703_p3 = pnand %p1702_p2, %p1696_p13 }
 0x5d5   : > { %v1056_v25 = vpop.permute.xlu1 %1055 }
 0x5db   : > { %v1047_v23 = vpop.permute.xlu0 %1046 }
 0x5dc   : > { %1050 = vst.msk [vmem:[#allocation5] sm:$0xf] %vm1049_vm6, %v1047_v23 }
 0x5dd   : > { %1059 = vst.msk [vmem:[#allocation5] sm:$0xf] %vm1058_vm7, %v1056_v25 }
 0x5e3   : > { %v1065_v26 = vpop.permute.xlu0 %1064 }
 0x5e4   : > { %1068 = vst.msk [vmem:[#allocation5] sm:$0xf] %vm1067_vm8, %v1065_v26 }
 0x5eb   : > { %v1069_v27 = vld [vmem:[#allocation5] sm:$0xf] }
 0x5ec   : > { %1571 = vmatmul.mubr.msk.bf16.vlgmr.msra.gmra.mxu1 %vm440_vm0, %v1069_v27 }
 0x5ed   : > { %1598 = vmatprep.mubr.msk.bf16.mxu1 %vm1756_vm1, %v1755_v8  ;;  %1583 = vmatpush3.bf16.msra.mxu1 %v1663_v42 }
 0x5ee   : > { %1584 = vmatprep.subr.bf16.mxu1 %v1755_v8 }
 0x5f1   : > { %1585 = vmatpush3.bf16.msra.mxu1 %v1664_v43 }
 0x5f2   : > { %1586 = vmatprep.subr.bf16.mxu1 %v1755_v8 }
 0x5f5   : > { %1587 = vmatpush3.bf16.msra.mxu1 %v1665_v53 }
 0x5f6   : > { %1588 = vmatprep.subr.bf16.mxu1 %v1755_v8 }
 0x5f9   : > { %1589 = vmatpush3.bf16.msra.mxu1 %v1666_v54 }
 0x5fa   : > { %1590 = vmatprep.subr.bf16.mxu1 %v1755_v8 }
 0x5fd   : > { %1591 = vmatpush3.bf16.msra.mxu1 %v1667_v55 }
 0x5fe   : > { %1592 = vmatprep.subr.bf16.mxu1 %v1755_v8 }
 0x601   : > { %1593 = vmatpush3.bf16.msra.mxu1 %v1668_v56 }
 0x602   : > { %1594 = vmatprep.subr.bf16.mxu1 %v1755_v8 }
 0x605   : > { %1595 = vmatpush3.bf16.msra.mxu1 %v1669_v57 }
 0x606   : > { %1596 = vmatprep.subr.bf16.mxu1 %v1755_v8 }
 0x609   : > { %1597 = vmatpush3.bf16.msra.mxu1 %v1670_v58 }
 0x6ac   : > { %v1130_v29 = vpop.f32.mrf.mxu1 }
 0x6ad   : > { %v1131_v30 = vadd.f32 %v1449_v28, %v1130_v29 }
 0x6ae   : > { %v1572_v31 = vpop.f32.mrf.mxu1 }
 0x6af   : > { %v2021_v32 = vadd.f32 %v1131_v30, %v1895_v0  ;;  %v1662_v0 = vld [vmem:[%s2135_s9] sm:$0xff]  }
 0x6b0   : > { %v1133_v33 = vpop.f32.mrf.mxu1  ;;  %1577 = vmatpush3.bf16.msra.mxu0 %v1662_v0 }
 0x6b1   : > { %v1139_v34 = vsel %vm440_vm0, %v2021_v32, 0.0 }
 0x6b2   : > { %1140 = vadd.xlane.f32.xlu1 %v1139_v34  ;;  %v1573_v35 = vpop.f32.mrf.mxu1 }
 0x73b   : > { %v1141_v36 = vpop.xlane.xlu1 %1140 }
 0x73c   : > { %v1142_v37 = vmul.f32 0.03125, %v1141_v36 }
 0x73e   : > { %v1143_v38 = vsub.f32 %v2021_v32, %v1142_v37 }
 0x740   : > { %v1144_v39 = vmul.f32 %v1143_v38, %v1143_v38 }
 0x742   : > { %v1145_v40 = vsel %vm440_vm0, %v1144_v39, 0.0 }
 0x743   : > { %1146 = vadd.xlane.f32.xlu0 %v1145_v40 }
 0x7cc   : > { %v1147_v44 = vpop.xlane.xlu0 %1146 }
 0x7cd   : > { %v1148_v45 = vmul.f32 0.03125, %v1147_v44 }
 0x7cf   : > { %v1149_v46 = vadd.f32 1e-05, %v1148_v45 }
 0x7d1   : > { %1689 = vrsqrt.f32 %v1149_v46 }
 0x7de   : > { %v1690_v47 = vpop.eup %1689 }
 0x7df   : > { %v1151_v48 = vmul.f32 %v1690_v47, %v1143_v38 }
 0x7e1   : > { %v1158_v50 = vmul.f32 %v1453_v24, %v1151_v48 }
 0x7e3   : > { %v1165_v51 = vadd.f32 %v1454_v49, %v1158_v50 }
 0x7e5   : > { %v1166_v52 = vpack.c.bf16 %v1165_v51, %v1165_v51 }
 0x7e7   : > { %1579 = vmatmul.mubr.msk.bf16.vlgmr.msra.gmra.mxu0 %vm440_vm0, %v1166_v52 }
 0x8a7   : > { %v1227_v60 = vpop.f32.mrf.mxu0 }
 0x8a8   : > { %v1228_v61 = vadd.f32 %v1455_v59, %v1227_v60 }
 0x8a9   : > { %v1580_v62 = vpop.f32.mrf.mxu0 }
 0x8aa   : > { %v1234_v63 = vmul.f32 0.70710677, %v1228_v61  ;;  %v1233_v8 = vmul.f32 0.5, %v1228_v61 }
 0x8ab   : > { %v1230_v1 = vpop.f32.mrf.mxu0 }
 0x8ac   : > { %1691 = verf.f32 %v1234_v63 }
 0x8ad   : > { %v1581_v2 = vpop.f32.mrf.mxu0 }
 0x8b9   : > { %v1692_v3 = vpop.eup %1691 }
 0x8ba   : > { %v1236_v4 = vadd.f32 1.0, %v1692_v3 }
 0x8bc   : > { %v1237_v5 = vmul.f32 %v1236_v4, %v1233_v8 }
 0x8be   : > { %v1238_v6 = vpack.c.bf16 %v1237_v5, %v1237_v5 }
 0x8c0   : > { %1599 = vmatmul.mubr.bf16.vlgmr.msra.gmra.mxu1 %v1238_v6 }
 0x980   : > { %v1344_v9 = vpop.f32.mrf.mxu1 }
 0x981   : > { %v1345_v10 = vadd.f32 %v1459_v7, %v1344_v9 }
 0x982   : > { %v1600_v11 = vpop.f32.mrf.mxu1 }
 0x983   : > { %v1350_v12 = vadd.f32 %v1345_v10, %v2021_v32 }
 0x984   : > { %v1347_v13 = vpop.f32.mrf.mxu1 }
 0x985   : > { %1351 = vst.msk [vmem:[%s431_s22] sm:$0xff] %vm440_vm0, %v1350_v12 }
 0x986   : > { %v1601_v14 = vpop.f32.mrf.mxu1 }
 0x987   : > { %1706 = shalt.err (!%p1703_p3)
}
 0x988   : > { %s1707_s21 = scalar_lea.hbm %s2084_s1, 128  ;;  %s1711_s24 = scalar_lea.hbm %s2139_s13, 256 }
 0x989   : > { %p1708_p4 = scmp.ne.s32.totalorder %s2084_s1, %s1707_s21  ;;  %p1712_p9 = scmp.lt.s32.totalorder %s2084_s1, %s2139_s13 }
 0x98a   : > { %p1713_p10 = scmp.lt.s32.totalorder %s1711_s24, %s1707_s21 }
 0x98b   : > { %p1709_p7 = pnand %p1708_p4, %p1880_p5 }
 0x98c   : > { %p1714_p11 = por %p1713_p10, %p1712_p9 }
 0x98d   : > { %p1710_p8 = pneg %p1709_p7 }
 0x98f   : > { %p1715_p12 = pnand %p1714_p11, %p1710_p8 }
 0x991   : > { %1718 = shalt.err (!%p1715_p12)
}
 0x992   : > { %1602 = dma.vmem_to_hbm [thread:$0]  (%p1880_p5), %s2086_s23, 128, %s2084_s1, %s1353_s29  }
 0x993 PF: > { %p1608_p13 = scmp.ge.s32.totalorder %s1753_s28, 2  ;;  %s1378_s15 = sand.u32 1, %s1741_s25  }
 0x994   : > { %s1379_s2 = scalar_lea.sflag [#allocation7], %s1378_s15 }
 0x995   : > { %p1605_p0 = pnand %p1608_p13, %p1884_p6 }
 0x997   : > { %p1606_p1 = pneg %p1605_p0 }
 0x999   : > { %1736 = dma.done.wait (%p1606_p1), %s1379_s2, 128  }
 0x99a   : > { %1738 = vsyncadd (%p1606_p1), %s1379_s2, 4294967168  ;;  %p23_p2 = scmp.ge.s32.totalorder %s1867_s14, 4   ;;  %s2148_s25 = smov %s1745_s26 }
 0x99b   : > { %s2149_s26 = smov %s1749_s27  ;;  %s2150_s27 = smov %s1878_s17 }
 0x99c   : > { %s2151_s28 = smov %s1867_s14  ;;  %25 = sbr.rel (!%p23_p2) target bundleno = 7 (0x7), region = 116 }
 0x9a1   :  { %1384 = vsyncpa [#allocation7], 1 }
 0x9a2   :  { %1386 = vsyncpa [#allocation7 + $0x1], 1 }

</bundles_post_ra>
